<compile_context>
chip_gen: v7x
topology: tpu7x:2x2x1
jax: 0.10.0
libtpu: 0.0.40
codegen_flags: <defaults>
</compile_context>

<pallas_src>
import jax
import jax.numpy as jnp
from jax.experimental import pallas as pl
from jax.experimental.pallas import tpu as pltpu


def _round_up(x: int, m: int) -> int:
    return ((x + m - 1) // m) * m


def _vmem_capacity_bytes() -> int:
    """Per-core VMEM capacity; conservative (v7x-sized) fallback."""
    try:
        return int(pltpu.get_tpu_info().vmem_capacity_bytes)
    except Exception:
        return 64 * 2**20


def _logit_loss_kernel(labels_ref, logits_ref, partial_ref):
    """One grid step: sum_b logits[b, labels[b]] over this tile's rows."""
    labels = labels_ref[...]                                   # (tb, 1) int32, padded rows = -1
    C = logits_ref.shape[1]
    # (1, C) column iota; the == broadcasts it across sublanes (no full-tile iota).
    col = jax.lax.broadcasted_iota(jnp.int32, (1, C), 1)
    mask = col == labels                                       # (tb, C) one-hot per row
    # Select (NOT multiply) so stale/garbage rows in the ragged last block —
    # including NaN/Inf — cannot leak into the sum; widen folded into the select.
    picked = jnp.where(mask, logits_ref[...].astype(jnp.float32), 0.0)
    partial_ref[0, 0] = jnp.sum(picked)


def logit_loss(logits, labels, *, targeted: bool = True, tb: int | None = None,
               force_pallas: bool = False):
    """Pallas implementation of LogitLoss.forward.

    logits: (B, C) float array; labels: (B,) int array with values in [0, C).
    Returns sum_b logits[b, labels[b]] as f32 (negated if targeted == False).
    """
    B, C = logits.shape
    itemsize = jnp.dtype(logits.dtype).itemsize

    # Tiny inputs (e.g. ImageNet attacks: B <= 512, C ~ 1000) are dominated by
    # fixed pallas_call overhead -> plain JAX gather + sum.
    if not force_pallas and B * C * itemsize < (2 << 20):
        idx = labels.reshape(B, 1).astype(jnp.int32)
        real = jnp.take_along_axis(logits, idx, axis=1)[:, 0]
        total = jnp.sum(real.astype(jnp.float32))
        return total if targeted else -total

    # Sublane tile per dtype packing (f32: 8, bf16/f16: 16, 8-bit: 32).
    sub = {1: 32, 2: 16}.get(itemsize, 8)

    # Generation-aware VMEM budget: leave headroom below physical capacity
    # (v7x: 64 MiB/TC -> ~48 MiB usable; v5e/v6e: 128 MiB -> capped anyway).
    capacity = _vmem_capacity_bytes()
    usable = max(24 << 20, capacity - (16 << 20))
    per_buf = max(2 << 20, min(16 << 20, (usable - (4 << 20)) // 2))

    # Per-row VMEM cost: logits row + the lane-padded (x128) labels row.
    bytes_per_row = C * itemsize + 128 * 4

    if tb is None:
        tb = per_buf // bytes_per_row                  # size tile by bytes, not rows
    tb = max(sub, (int(tb) // sub) * sub)              # sublane-multiple
    tb = min(tb, max(sub, _round_up(B, sub)))          # don't over-allocate tiny batches

    num_tiles = -(-B // tb)                            # cdiv
    B_pad = num_tiles * tb

    labels2d = labels.astype(jnp.int32).reshape(B, 1)
    if B_pad != B:
        # Pad only the labels (cheap: B*4 bytes). -1 never matches the column
        # iota, so the ragged last logits block's garbage rows contribute 0.
        labels2d = jnp.pad(labels2d, ((0, B_pad - B), (0, 0)), constant_values=-1)

    need = 2 * tb * bytes_per_row + (2 << 20)          # double-buffered tiles + slack
    vmem_limit = int(min(max(need, 16 << 20), usable))

    cost = pl.CostEstimate(
        flops=3 * B_pad * C,                           # cmp + select + add per element
        transcendentals=0,
        bytes_accessed=B * C * itemsize + B_pad * 4 + num_tiles * 4,
    )

    partials = pl.pallas_call(
        _logit_loss_kernel,
        out_shape=jax.ShapeDtypeStruct((num_tiles, 1), jnp.float32),
        grid=(num_tiles,),
        in_specs=[
            # Labels: one small (tb, 1) DMA per step, hidden under the logits DMA.
            pl.BlockSpec((tb, 1), lambda i: (i, 0)),
            # Logits: large streaming tile per step (double-buffered); the last
            # block may extend past B (no wrapper-side pad copy).
            pl.BlockSpec((tb, C), lambda i: (i, 0)),
        ],
        # One partial per tile => no cross-step state => safe to run "parallel"
        # (uses both v7x TensorCores; harmless on v5e/v6e).
        out_specs=pl.BlockSpec((1, 1), lambda i: (i, 0), memory_space=pltpu.SMEM),
        compiler_params=pltpu.CompilerParams(
            dimension_semantics=("parallel",),
            vmem_limit_bytes=vmem_limit,
        ),
        cost_estimate=cost,
    )(labels2d, logits)

    total = jnp.sum(partials[:, 0])
    return total if targeted else -total


if __name__ == "__main__":
    key = jax.random.PRNGKey(0)
    k_logits, k_labels = jax.random.split(key)

    # Small shapes consistent with the module: batch=8, classes=16.
    B, C = 8, 16
    logits = jax.random.normal(k_logits, (B, C), dtype=jnp.float32)
    labels = jax.random.randint(k_labels, (B,), 0, C, dtype=jnp.int32)

    real = jnp.take_along_axis(logits, labels[:, None], axis=1)[:, 0]
    ref = jnp.sum(real)

    # 1) Small-input dispatch path (plain JAX gather + sum).
    loss_small = jax.block_until_ready(logit_loss(logits, labels, targeted=True))
    assert jnp.allclose(loss_small, ref, rtol=1e-6, atol=1e-6), (loss_small, ref)

    # 2) Force the Pallas kernel on the same small shape (single tile).
    loss_pl = jax.block_until_ready(
        logit_loss(logits, labels, targeted=True, force_pallas=True))
    assert jnp.allclose(loss_pl, ref, rtol=1e-6, atol=1e-6), (loss_pl, ref)

    # untargeted path (negated sum) through the kernel.
    loss_u = jax.block_until_ready(
        logit_loss(logits, labels, targeted=False, force_pallas=True))
    assert jnp.allclose(loss_u, -ref, rtol=1e-6, atol=1e-6), (loss_u, -ref)

    # 3) Multi-tile grid + ragged last block (no logits pad) + bf16 sublane tiling.
    B2, C2 = 100, 384
    logits2 = jax.random.normal(jax.random.PRNGKey(1), (B2, C2), dtype=jnp.bfloat16)
    labels2 = jax.random.randint(jax.random.PRNGKey(2), (B2,), 0, C2, dtype=jnp.int32)
    ref2 = jnp.sum(
        jnp.take_along_axis(logits2.astype(jnp.float32), labels2[:, None], axis=1)[:, 0])

    loss2 = jax.block_until_ready(
        logit_loss(logits2, labels2, targeted=True, tb=32, force_pallas=True))
    assert jnp.allclose(loss2, ref2, rtol=1e-2, atol=1e-2), (loss2, ref2)

    # 4) Auto (byte-sized) tile selection on the same ragged-batch input.
    loss3 = jax.block_until_ready(
        logit_loss(logits2, labels2, targeted=True, force_pallas=True))
    assert jnp.allclose(loss3, ref2, rtol=1e-2, atol=1e-2), (loss3, ref2)

    print("KERNEL_OK")
</pallas_src>

<mosaic_0001>
module attributes {stable_mosaic.version = 11 : i64} {
  func.func @_logit_loss_kernel(%arg0: i32, %arg1: memref<8x1xi32, #tpu.memory_space<vmem>>, %arg2: memref<8x16xf32, #tpu.memory_space<vmem>>, %arg3: memref<1x1xf32, #tpu.memory_space<smem>>) attributes {dimension_semantics = [#tpu.dimension_semantics<parallel>], iteration_bounds = array<i64: 1>, scalar_prefetch = 0 : i64, scratch_operands = 0 : i64, tpu.core_type = #tpu.core_type<tc>, window_params = [{transform_indices = @transform_0, window_bounds = array<i64: 8, 1>}, {transform_indices = @transform_1, window_bounds = array<i64: 8, 16>}, {transform_indices = @transform_2, window_bounds = array<i64: 1, 1>}]} {
    %c0 = arith.constant 0 : index
    %c0_0 = arith.constant 0 : index
    %0 = vector.load %arg1[%c0, %c0_0] : memref<8x1xi32, #tpu.memory_space<vmem>>, vector<8x1xi32>
    %1 = tpu.iota {dimensions = array<i32: 1>} : vector<1x16xi32>
    %2 = vector.broadcast %1 : vector<1x16xi32> to vector<8x16xi32>
    %3 = vector.broadcast %0 : vector<8x1xi32> to vector<8x16xi32>
    %4 = arith.cmpi eq, %2, %3 : vector<8x16xi32>
    %c0_1 = arith.constant 0 : index
    %c0_2 = arith.constant 0 : index
    %5 = vector.load %arg2[%c0_1, %c0_2] : memref<8x16xf32, #tpu.memory_space<vmem>>, vector<8x16xf32>
    %cst = arith.constant 0.000000e+00 : f32
    %6 = vector.broadcast %cst : f32 to vector<8x16xf32>
    %7 = arith.select %4, %5, %6 : vector<8x16xi1>, vector<8x16xf32>
    %8 = vector.shape_cast %7 : vector<8x16xf32> to vector<1x8x16xf32>
    %cst_3 = arith.constant dense<0.000000e+00> : vector<1xf32>
    %9 = vector.multi_reduction <add>, %8, %cst_3 [1, 2] : vector<1x8x16xf32> to vector<1xf32>
    %10 = vector.shape_cast %9 : vector<1xf32> to vector<1x1x1xf32>
    %11 = vector.extract %10[0, 0, 0] : f32 from vector<1x1x1xf32>
    %c0_4 = arith.constant 0 : index
    %c0_5 = arith.constant 0 : index
    %12 = memref.load %arg3[%c0_4, %c0_5] : memref<1x1xf32, #tpu.memory_space<smem>>
    memref.store %11, %arg3[%c0_4, %c0_5] : memref<1x1xf32, #tpu.memory_space<smem>>
    return
  }
  func.func @transform_0(%arg0: i32) -> (i32, i32) {
    %c0_i32 = arith.constant 0 : i32
    %c0_i32_0 = arith.constant 0 : i32
    return %arg0, %c0_i32 : i32, i32
  }
  func.func @transform_1(%arg0: i32) -> (i32, i32) {
    %c0_i32 = arith.constant 0 : i32
    %c0_i32_0 = arith.constant 0 : i32
    return %arg0, %c0_i32 : i32, i32
  }
  func.func @transform_2(%arg0: i32) -> (i32, i32) {
    %c0_i32 = arith.constant 0 : i32
    %c0_i32_0 = arith.constant 0 : i32
    return %arg0, %c0_i32 : i32, i32
  }
}

</mosaic_0001>

<bundles_post_ra>
// kernel: tpu_custom_call.1
= control target key start
LH: loop header
LB: loop body
LE: loop exit
PB: predicated region body
PF: predicated region fallthrough
CT: control target
= control target key end

     0   :  { %s99_s0 = inlined_call_operand.vmem [shape: s32[8,1], index: 0, kind: input, shape index: {}]   ;;  %s100_s1 = inlined_call_operand.vmem [shape: f32[8,16], index: 1, kind: input, shape index: {}]   ;;  %s101_s2 = inlined_call_operand.hbm [shape: f32[1,1], index: 2, kind: output, shape index: {}]  }
   0x1   :  { %v12_v0 = vld [vmem:[%s99_s0] sm:$0xff] }
   0x2   :  { %7 = vsyncpa [#allocation3], 0  ;;  %v64_v1 = vmov 0   ;;  %v13_v2 = vlaneseq  ;;  %v19_v4 = vld [vmem:[%s100_s1] sm:$0xff]  ;;  %vm21_vm0 = vcmask 130048   ;;  %s52_s1 = scalar_lea.hbm %s101_s2, 16 }
   0x3   :  { %51 = vset.pattern.permute.xlu0 %v64_v1  ;;  %p53_p0 = scmp.ne.s32.totalorder %s101_s2, %s52_s1  ;;  %p56_p1 = scmp.lt.u32.totalorder %s52_s1, %s101_s2 }
   0x4   :  { %16 = vperm.xlu0 %51, %v12_v0   ;;  %v14_v3 = vand.u32 127, %v13_v2 }
   0x5   :  { %p58_p2 = pnand %p56_p1, %p53_p0 }
  0x83   :  { %v17_v5 = vpop.permute.xlu0 %16 }
  0x84   :  { %vm18_vm1 = vcmp.eq.s32.totalorder %v14_v3, %v17_v5 }
  0x85   :  { %v20_v6 = vsel %vm18_vm1, %v19_v4, 0.0 }
  0x86   :  { %v22_v7 = vsel %vm21_vm0, %v20_v6, 0.0 }
  0x87   :  { %23 = vadd.xlane.f32.xlu0 %v22_v7 }
 0x114   :  { %v24_v8 = vpop.xlane.xlu0 %23 }
 0x115   :  { %v25_v9 = vrot.slane %v24_v8, 4 }
 0x117   :  { %v26_v10 = vadd.f32 %v25_v9, %v24_v8 }
 0x119   :  { %v27_v11 = vrot.slane %v26_v10, 2 }
 0x11b   :  { %v28_v12 = vadd.f32 %v27_v11, %v26_v10 }
 0x11d   :  { %v29_v13 = vrot.slane %v28_v12, 1 }
 0x11f   :  { %v30_v14 = vadd.f32 %v29_v13, %v28_v12 }
 0x121   :  { %47 = vpush %v30_v14 }
 0x152   :  { %s48_s0 = spop %47 }
 0x153   :  { %33 = sst [smem:[#allocation2]] %s48_s0 }
 0x154   :  { %61 = shalt.err (!%p58_p2)
}
 0x155   :  { %s65_s19 = smov [#allocation2]  }
 0x156   :  { %41 = dma.smem_to_hbm %s65_s19, 16, %s101_s2, [#allocation3]  }
 0x157   :  { %62 = dma.done.wait [#allocation3], 16  }
 0x158   :  { %63 = vsyncadd [#allocation3], 4294967280 }
 0x159   :  { %45 = sfence }
 0x15a   :  { %46 = vsyncpa [#allocation3], 1 }

</bundles_post_ra>
